<compile_context>
chip_gen: v7x
topology: tpu7x:2x2x1
jax: 0.10.0
libtpu: 0.0.40
codegen_flags: <defaults>
</compile_context>

<pallas_src>
import functools

import jax
import jax.numpy as jnp
from jax.experimental import pallas as pl
from jax.experimental.pallas import tpu as pltpu


def discriminator_kernel(x_ref, w1_ref, w2_ref, w3_ref, b_ref, out_ref, *,
                         d_h1, d_h2):
    """Whole MLP forward for one batch tile, entirely in VMEM.

    x_ref:   (TB, D_in)        activations (f32 or bf16)
    w1_ref:  (D_in, D_h1)      bfloat16
    w2_ref:  (D_h1, D_h2)      bfloat16
    w3_ref:  (D_h2, 128)       bfloat16, columns >= d_out are zero
    b_ref:   (3, 128)          f32; row n = layer-(n+1) bias.  Row 2's padded
                               columns hold -1e30 so softmax of padding == 0.
    out_ref: (TB, 128)         f32 softmax probabilities (lane-dense slab)
    """
    d_out_pad = w3_ref.shape[1]

    # bf16 MXU operands, f32 accumulation.  Elementwise work (bias add, ReLU,
    # softmax) stays in f32 -- v5e has no bf16 VPU/EUP and f32 matches torch.
    x = x_ref[...].astype(jnp.bfloat16)

    b1 = b_ref[0:1, 0:d_h1]
    b2 = b_ref[1:2, 0:d_h2]
    b3 = b_ref[2:3, 0:d_out_pad]

    # Layer 1 (hidden): Linear -> dropout(identity, eval) -> ReLU
    h = jnp.dot(x, w1_ref[...], preferred_element_type=jnp.float32) + b1
    h = jnp.maximum(h, 0.0).astype(jnp.bfloat16)

    # Layer 2 (hidden): Linear -> dropout(identity, eval) -> ReLU
    h = jnp.dot(h, w2_ref[...], preferred_element_type=jnp.float32) + b2
    h = jnp.maximum(h, 0.0).astype(jnp.bfloat16)

    # Layer 3 (output): Linear -> dropout(identity, eval) -> Softmax(dim=-1).
    # Padded logit columns are -1e30 (from b3), so exp() underflows to 0 and
    # they contribute nothing to the max, the sum, or the probabilities.
    logits = jnp.dot(h, w3_ref[...], preferred_element_type=jnp.float32) + b3
    m = jnp.max(logits, axis=-1, keepdims=True)
    e = jnp.exp(logits - m)
    denom = jnp.sum(e, axis=-1, keepdims=True)
    # Exact reciprocal: rows must sum to 1 (approx=True only gives ~1e-2/1e-3).
    inv = pl.reciprocal(denom, approx=False)
    out_ref[...] = (e * inv).astype(out_ref.dtype)


def prepare_params(params, *, lane_width=128):
    """One-time parameter prep (hoisted out of the forward path).

    Expects f32 torch-style params already transposed to (in, out):
      params = {"w1","b1","w2","b2","w3","b3"}.
    Returns bf16 weights, a lane-padded w3, and the biases packed into a
    single (3, lane_width) f32 tile (row 2 padded with -1e30 for softmax).
    """
    w1, b1 = params["w1"], params["b1"]
    w2, b2 = params["w2"], params["b2"]
    w3, b3 = params["w3"], params["b3"]
    d_in, d_h1 = w1.shape
    d_h2 = w2.shape[1]
    d_out = w3.shape[1]

    d_out_pad = pl.cdiv(d_out, lane_width) * lane_width
    bias_width = max(pl.cdiv(max(d_h1, d_h2), lane_width) * lane_width,
                     d_out_pad)

    w1b = w1.astype(jnp.bfloat16)
    w2b = w2.astype(jnp.bfloat16)
    w3b = jnp.zeros((d_h2, d_out_pad), jnp.bfloat16)
    w3b = w3b.at[:, :d_out].set(w3.astype(jnp.bfloat16))

    b_pack = jnp.zeros((3, bias_width), jnp.float32)
    b_pack = b_pack.at[0, :d_h1].set(b1.astype(jnp.float32))
    b_pack = b_pack.at[1, :d_h2].set(b2.astype(jnp.float32))
    b_pack = b_pack.at[2, :].set(jnp.float32(-1e30))   # softmax(-1e30) == 0
    b_pack = b_pack.at[2, :d_out].set(b3.astype(jnp.float32))

    return {"w1": w1b, "w2": w2b, "w3": w3b, "b_pack": b_pack,
            "d_in": d_in, "d_h1": d_h1, "d_h2": d_h2,
            "d_out": d_out, "d_out_pad": d_out_pad}


def _choose_batch_tile(batch):
    """Pick an MXU/DMA-friendly batch tile.

    Small batches run in a single grid step.  Large batches use tiles that are
    multiples of 256 and up to 4096 rows (multi-MiB per-step HBM traffic, so
    the ~0.35us/step pipeline overhead is fully amortized), capped at ~batch/2
    so the grid keeps >= 2 "parallel" steps and both v7x TensorCores get work.
    """
    if batch <= 512:
        return max(8, pl.cdiv(batch, 8) * 8)
    half = max(256, (batch // 2) // 256 * 256)
    return min(4096, half)


def discriminator_forward(x, prepped, *, batch_tile=None):
    """x: (B, D_in) f32 or bf16. prepped: output of prepare_params()."""
    w1b, w2b, w3b = prepped["w1"], prepped["w2"], prepped["w3"]
    b_pack = prepped["b_pack"]
    d_in = prepped["d_in"]
    d_h1, d_h2 = prepped["d_h1"], prepped["d_h2"]
    d_out, d_out_pad = prepped["d_out"], prepped["d_out_pad"]
    batch = x.shape[0]

    # Batch tiling: pad instead of asserting divisibility.
    tb = _choose_batch_tile(batch) if batch_tile is None else max(
        8, pl.cdiv(batch_tile, 8) * 8)
    batch_pad = pl.cdiv(batch, tb) * tb
    if batch_pad != batch:
        x = jnp.pad(x, ((0, batch_pad - batch), (0, 0)))
    grid = (batch_pad // tb,)

    kernel = functools.partial(discriminator_kernel, d_h1=d_h1, d_h2=d_h2)

    const = lambda i: (0, 0)  # weights/biases: same block every step (resident)

    out = pl.pallas_call(
        kernel,
        out_shape=jax.ShapeDtypeStruct((batch_pad, d_out_pad), jnp.float32),
        grid_spec=pltpu.PrefetchScalarGridSpec(
            num_scalar_prefetch=0,
            grid=grid,
            in_specs=[
                pl.BlockSpec((tb, d_in), lambda i: (i, 0)),
                pl.BlockSpec(w1b.shape, const),
                pl.BlockSpec(w2b.shape, const),
                pl.BlockSpec(w3b.shape, const),
                pl.BlockSpec(b_pack.shape, const),
            ],
            out_specs=pl.BlockSpec((tb, d_out_pad), lambda i: (i, 0)),
        ),
        compiler_params=pltpu.CompilerParams(
            dimension_semantics=("parallel",),
            vmem_limit_bytes=32 * 1024 * 1024),
    )(x, w1b, w2b, w3b, b_pack)

    return out[:batch, :d_out]


def init_params(key, layer_sizes):
    """Deterministic synthetic init matching torch Linear's uniform scheme.
    Returns f32 weights already transposed to (in_features, out_features)."""
    params = {}
    ks = jax.random.split(key, 2 * (len(layer_sizes) - 1))
    for n, (d0, d1) in enumerate(zip(layer_sizes[:-1], layer_sizes[1:]), start=1):
        bound = 1.0 / jnp.sqrt(d0)
        w_torch = jax.random.uniform(ks[2 * (n - 1)], (d1, d0),
                                     minval=-bound, maxval=bound,
                                     dtype=jnp.float32)
        b = jax.random.uniform(ks[2 * (n - 1) + 1], (d1,),
                               minval=-bound, maxval=bound, dtype=jnp.float32)
        params[f"w{n}"] = w_torch.T  # (in, out)
        params[f"b{n}"] = b
    return params


if __name__ == "__main__":
    # Module hyperparameters (synthetic, deterministic)
    input_dim = 32
    hidden_layer_dim = [64, 64]
    output_dim = 8
    layer_sizes = [input_dim] + hidden_layer_dim + [output_dim]

    key = jax.random.PRNGKey(0)
    kx, kp = jax.random.split(key)

    B = 16
    x = jax.random.normal(kx, (B, input_dim), dtype=jnp.float32)
    params = init_params(kp, layer_sizes)
    prepped = prepare_params(params)            # one-time, outside forward path

    out = jax.block_until_ready(discriminator_forward(x, prepped))
    assert out.shape == (B, output_dim)

    # Sanity check vs. pure-JAX f32 reference.  Kernel uses bf16 MXU operands,
    # so allow a bf16-scale tolerance on the probabilities; row sums use the
    # exact reciprocal and must be ~1 to f32 rounding.
    h = jnp.maximum(x @ params["w1"] + params["b1"], 0.0)
    h = jnp.maximum(h @ params["w2"] + params["b2"], 0.0)
    ref = jax.nn.softmax(h @ params["w3"] + params["b3"], axis=-1)
    assert jnp.allclose(out, ref, atol=2e-2, rtol=2e-2), "mismatch vs reference"
    assert jnp.allclose(out.sum(axis=-1), 1.0, atol=1e-4), "rows must sum to 1"
    assert bool(jnp.all(jnp.isfinite(out))), "non-finite output"

    print("KERNEL_OK")
</pallas_src>

<mosaic_0001>
module attributes {stable_mosaic.version = 11 : i64} {
  func.func @discriminator_kernel(%arg0: i32, %arg1: memref<16x32xf32, #tpu.memory_space<vmem>>, %arg2: memref<32x64xbf16, #tpu.memory_space<vmem>>, %arg3: memref<64x64xbf16, #tpu.memory_space<vmem>>, %arg4: memref<64x128xbf16, #tpu.memory_space<vmem>>, %arg5: memref<3x128xf32, #tpu.memory_space<vmem>>, %arg6: memref<16x128xf32, #tpu.memory_space<vmem>>) attributes {dimension_semantics = [#tpu.dimension_semantics<parallel>], iteration_bounds = array<i64: 1>, scalar_prefetch = 0 : i64, scratch_operands = 0 : i64, tpu.core_type = #tpu.core_type<tc>, window_params = [{transform_indices = @transform_0, window_bounds = array<i64: 16, 32>}, {pipeline_mode = #tpu.pipeline_mode<synchronous>, transform_indices = @transform_1, window_bounds = array<i64: 32, 64>}, {pipeline_mode = #tpu.pipeline_mode<synchronous>, transform_indices = @transform_2, window_bounds = array<i64: 64, 64>}, {pipeline_mode = #tpu.pipeline_mode<synchronous>, transform_indices = @transform_3, window_bounds = array<i64: 64, 128>}, {pipeline_mode = #tpu.pipeline_mode<synchronous>, transform_indices = @transform_4, window_bounds = array<i64: 3, 128>}, {transform_indices = @transform_5, window_bounds = array<i64: 16, 128>}]} {
    %c0 = arith.constant 0 : index
    %c0_0 = arith.constant 0 : index
    %0 = vector.load %arg1[%c0, %c0_0] : memref<16x32xf32, #tpu.memory_space<vmem>>, vector<16x32xf32>
    %1 = arith.truncf %0 : vector<16x32xf32> to vector<16x32xbf16>
    %c0_1 = arith.constant 0 : index
    %c0_2 = arith.constant 0 : index
    %2 = vector.load %arg5[%c0_1, %c0_2] : memref<3x128xf32, #tpu.memory_space<vmem>>, vector<1x64xf32>
    %c1 = arith.constant 1 : index
    %c0_3 = arith.constant 0 : index
    %3 = vector.load %arg5[%c1, %c0_3] : memref<3x128xf32, #tpu.memory_space<vmem>>, vector<1x64xf32>
    %c2 = arith.constant 2 : index
    %c0_4 = arith.constant 0 : index
    %4 = vector.load %arg5[%c2, %c0_4] : memref<3x128xf32, #tpu.memory_space<vmem>>, vector<1x128xf32>
    %c0_5 = arith.constant 0 : index
    %c0_6 = arith.constant 0 : index
    %5 = vector.load %arg2[%c0_5, %c0_6] : memref<32x64xbf16, #tpu.memory_space<vmem>>, vector<32x64xbf16>
    %cst = arith.constant dense<0.000000e+00> : vector<16x64xf32>
    %6 = tpu.matmul %1, %5, %cst {dimension_numbers = #tpu.dot_dimension_numbers<[1], [0], [0], [1], [0, 0, 1, 1], [], []>} : vector<16x32xbf16>, vector<32x64xbf16>, vector<16x64xf32> -> vector<16x64xf32>
    %7 = vector.broadcast %2 : vector<1x64xf32> to vector<16x64xf32>
    %8 = arith.addf %6, %7 : vector<16x64xf32>
    %cst_7 = arith.constant 0.000000e+00 : f32
    %9 = vector.broadcast %cst_7 : f32 to vector<16x64xf32>
    %10 = arith.maximumf %8, %9 : vector<16x64xf32>
    %11 = arith.truncf %10 : vector<16x64xf32> to vector<16x64xbf16>
    %c0_8 = arith.constant 0 : index
    %c0_9 = arith.constant 0 : index
    %12 = vector.load %arg3[%c0_8, %c0_9] : memref<64x64xbf16, #tpu.memory_space<vmem>>, vector<64x64xbf16>
    %cst_10 = arith.constant dense<0.000000e+00> : vector<16x64xf32>
    %13 = tpu.matmul %11, %12, %cst_10 {dimension_numbers = #tpu.dot_dimension_numbers<[1], [0], [0], [1], [0, 0, 1, 1], [], []>} : vector<16x64xbf16>, vector<64x64xbf16>, vector<16x64xf32> -> vector<16x64xf32>
    %14 = vector.broadcast %3 : vector<1x64xf32> to vector<16x64xf32>
    %15 = arith.addf %13, %14 : vector<16x64xf32>
    %cst_11 = arith.constant 0.000000e+00 : f32
    %16 = vector.broadcast %cst_11 : f32 to vector<16x64xf32>
    %17 = arith.maximumf %15, %16 : vector<16x64xf32>
    %18 = arith.truncf %17 : vector<16x64xf32> to vector<16x64xbf16>
    %c0_12 = arith.constant 0 : index
    %c0_13 = arith.constant 0 : index
    %19 = vector.load %arg4[%c0_12, %c0_13] : memref<64x128xbf16, #tpu.memory_space<vmem>>, vector<64x128xbf16>
    %cst_14 = arith.constant dense<0.000000e+00> : vector<16x128xf32>
    %20 = tpu.matmul %18, %19, %cst_14 {dimension_numbers = #tpu.dot_dimension_numbers<[1], [0], [0], [1], [0, 0, 1, 1], [], []>} : vector<16x64xbf16>, vector<64x128xbf16>, vector<16x128xf32> -> vector<16x128xf32>
    %21 = vector.broadcast %4 : vector<1x128xf32> to vector<16x128xf32>
    %22 = arith.addf %20, %21 : vector<16x128xf32>
    %cst_15 = arith.constant dense<0xFF800000> : vector<16xf32>
    %23 = vector.multi_reduction <maximumf>, %22, %cst_15 [1] : vector<16x128xf32> to vector<16xf32>
    %24 = vector.shape_cast %23 : vector<16xf32> to vector<16x1xf32>
    %25 = vector.broadcast %24 : vector<16x1xf32> to vector<16x128xf32>
    %26 = arith.subf %22, %25 : vector<16x128xf32>
    %27 = math.exp %26 : vector<16x128xf32>
    %cst_16 = arith.constant dense<0.000000e+00> : vector<16xf32>
    %28 = vector.multi_reduction <add>, %27, %cst_16 [1] : vector<16x128xf32> to vector<16xf32>
    %29 = vector.shape_cast %28 : vector<16xf32> to vector<16x1xf32>
    %30 = tpu.reciprocal %29 : vector<16x1xf32> -> vector<16x1xf32>
    %31 = vector.broadcast %30 : vector<16x1xf32> to vector<16x128xf32>
    %32 = arith.mulf %27, %31 : vector<16x128xf32>
    %c0_17 = arith.constant 0 : index
    %c0_18 = arith.constant 0 : index
    %33 = vector.load %arg6[%c0_17, %c0_18] : memref<16x128xf32, #tpu.memory_space<vmem>>, vector<16x128xf32>
    tpu.vector_store %arg6[%c0_17, %c0_18], %32 {strides = array<i32>} : memref<16x128xf32, #tpu.memory_space<vmem>>, vector<16x128xf32>,
    return
  }
  func.func @transform_0(%arg0: i32) -> (i32, i32) {
    %c0_i32 = arith.constant 0 : i32
    %c0_i32_0 = arith.constant 0 : i32
    return %arg0, %c0_i32 : i32, i32
  }
  func.func @transform_1(%arg0: i32) -> (i32, i32) {
    %c0_i32 = arith.constant 0 : i32
    %c0_i32_0 = arith.constant 0 : i32
    %c0_i32_1 = arith.constant 0 : i32
    return %c0_i32, %c0_i32_0 : i32, i32
  }
  func.func @transform_2(%arg0: i32) -> (i32, i32) {
    %c0_i32 = arith.constant 0 : i32
    %c0_i32_0 = arith.constant 0 : i32
    %c0_i32_1 = arith.constant 0 : i32
    return %c0_i32, %c0_i32_0 : i32, i32
  }
  func.func @transform_3(%arg0: i32) -> (i32, i32) {
    %c0_i32 = arith.constant 0 : i32
    %c0_i32_0 = arith.constant 0 : i32
    %c0_i32_1 = arith.constant 0 : i32
    return %c0_i32, %c0_i32_0 : i32, i32
  }
  func.func @transform_4(%arg0: i32) -> (i32, i32) {
    %c0_i32 = arith.constant 0 : i32
    %c0_i32_0 = arith.constant 0 : i32
    %c0_i32_1 = arith.constant 0 : i32
    return %c0_i32, %c0_i32_0 : i32, i32
  }
  func.func @transform_5(%arg0: i32) -> (i32, i32) {
    %c0_i32 = arith.constant 0 : i32
    %c0_i32_0 = arith.constant 0 : i32
    return %arg0, %c0_i32 : i32, i32
  }
}

</mosaic_0001>

<bundles_post_ra>
// kernel: tpu_custom_call.1
= control target key start
LH: loop header
LB: loop body
LE: loop exit
PB: predicated region body
PF: predicated region fallthrough
CT: control target
= control target key end

     0   :  { %10 = vsyncpa [#allocation3], 0  ;;  %s699_s0 = inlined_call_operand.hbm [shape: f32[16,32], index: 0, kind: input, shape index: {}]   ;;  %s700_s1 = inlined_call_operand.hbm [shape: bf16[32,64], index: 1, kind: input, shape index: {}]   ;;  %s701_s2 = inlined_call_operand.hbm [shape: bf16[64,64], index: 2, kind: input, shape index: {}]   ;;  %s702_s3 = inlined_call_operand.hbm [shape: bf16[64,128], index: 3, kind: input, shape index: {}]   ;;  %s703_s4 = inlined_call_operand.vmem [shape: f32[3,128], index: 4, kind: input, shape index: {}]   ;;  %s704_s5 = inlined_call_operand.hbm [shape: f32[16,128], index: 5, kind: output, shape index: {}]  }
   0x1   :  { %11 = vsyncpa [#allocation6], 0 }
   0x2   :  { %12 = vsyncpa [#allocation9], 0 }
   0x3   :  { %13 = vsyncpa [#allocation4], 0  ;;  %s562_s18 = smov [#allocation5]   ;;  %s444_s22 = scalar_lea.hbm %s700_s1, 256 }
   0x4   :  { %s31_s19 = sshll.u32 %s562_s18, 4  ;;  %p445_p0 = scmp.ne.s32.totalorder %s700_s1, %s444_s22  ;;  %s32_s19 = int_to_ptr.vmem [resolvable:$true] %s31_s19 }
   0x5   :  { %p448_p1 = scmp.lt.u32.totalorder %s444_s22, %s700_s1 }
   0x7   :  { %p450_p2 = pnand %p448_p1, %p445_p0 }
   0x9   :  { %453 = shalt.err (!%p450_p2)
}
   0xa   :  { %s454_s27 = scalar_lea.vmem %s32_s19, 256  ;;  %p459_p4 = scmp.lt.s32.totalorder %s32_s19, %s32_s19 }
   0xb   :  { %p455_p3 = scmp.ne.s32.totalorder %s32_s19, %s454_s27  ;;  %p460_p5 = scmp.lt.s32.totalorder %s454_s27, %s454_s27 }
   0xd   :  { %p461_p6 = por %p460_p5, %p459_p4 }
   0xf   :  { %p462_p7 = pnand %p461_p6, %p455_p3 }
  0x11   :  { %465 = shalt.err (!%p462_p7)
}
  0x12   :  { %s563_s28 = smov 64   ;;  %s564_s29 = smov 4  }
  0x13   :  { %37 = dma.hbm_to_vmem [thread:$0]  %s700_s1, 256, %s32_s19, [#allocation6], %s563_s28, %s563_s28, %s564_s29  }
  0x14   :  { %s565_s7 = smov [#allocation2]   ;;  %s466_s11 = scalar_lea.hbm %s699_s0, 256 }
  0x15   :  { %s19_s8 = sshll.u32 %s565_s7, 4  ;;  %p467_p8 = scmp.ne.s32.totalorder %s699_s0, %s466_s11  ;;  %s20_s8 = int_to_ptr.vmem [resolvable:$true] %s19_s8 }
  0x16   :  { %p470_p9 = scmp.lt.u32.totalorder %s466_s11, %s699_s0 }
  0x18   :  { %p472_p10 = pnand %p470_p9, %p467_p8 }
  0x1a   :  { %475 = shalt.err (!%p472_p10)
}
  0x1b   :  { %s476_s16 = scalar_lea.vmem %s20_s8, 256  ;;  %p481_p12 = scmp.lt.s32.totalorder %s20_s8, %s20_s8 }
  0x1c   :  { %p477_p11 = scmp.ne.s32.totalorder %s20_s8, %s476_s16  ;;  %p482_p13 = scmp.lt.s32.totalorder %s476_s16, %s476_s16 }
  0x1e   :  { %p483_p0 = por %p482_p13, %p481_p12 }
  0x20   :  { %p484_p1 = pnand %p483_p0, %p477_p11 }
  0x22   :  { %487 = shalt.err (!%p484_p1)
}
  0x23   :  { %s566_s1 = smov 128   ;;  %s567_s17 = smov 8  }
  0x24   :  { %25 = dma.hbm_to_vmem [thread:$0]  %s699_s0, 256, %s20_s8, [#allocation3], %s566_s1, %s566_s1, %s567_s17  }
  0x25   :  { %s568_s20 = smov [#allocation7]   ;;  %s569_s22 = smov [#allocation8]  }
  0x26   :  { %s43_s21 = sshll.u32 %s568_s20, 4  ;;  %s55_s23 = sshll.u32 %s569_s22, 4  ;;  %s44_s21 = int_to_ptr.vmem [resolvable:$true] %s43_s21  ;;  %s633_s23 = int_to_ptr.vmem [resolvable:$true] %s55_s23 }
  0x27   :  { %s488_s26 = scalar_lea.hbm %s701_s2, 512 }
  0x28   :  { %p489_p2 = scmp.ne.s32.totalorder %s701_s2, %s488_s26  ;;  %p492_p3 = scmp.lt.u32.totalorder %s488_s26, %s701_s2 }
  0x2a   :  { %p494_p4 = pnand %p492_p3, %p489_p2 }
  0x2c   :  { %497 = shalt.err (!%p494_p4)
}
  0x2d   :  { %s498_s0 = scalar_lea.vmem %s44_s21, 512  ;;  %p503_p6 = scmp.lt.s32.totalorder %s44_s21, %s44_s21 }
  0x2e   :  { %p499_p5 = scmp.ne.s32.totalorder %s44_s21, %s498_s0  ;;  %p504_p7 = scmp.lt.s32.totalorder %s498_s0, %s498_s0 }
  0x30   :  { %p505_p8 = por %p504_p7, %p503_p6 }
  0x32   :  { %p506_p9 = pnand %p505_p8, %p499_p5 }
  0x34   :  { %509 = shalt.err (!%p506_p9)
}
  0x35   :  { %49 = dma.hbm_to_vmem [thread:$0]  %s701_s2, 512, %s44_s21, [#allocation6], %s563_s28, %s563_s28, %s564_s29  }
  0x36   :  { %s510_s12 = scalar_lea.hbm %s702_s3, 512 }
  0x37   :  { %p511_p10 = scmp.ne.s32.totalorder %s702_s3, %s510_s12  ;;  %p514_p11 = scmp.lt.u32.totalorder %s510_s12, %s702_s3 }
  0x39   :  { %p516_p12 = pnand %p514_p11, %p511_p10 }
  0x3b   :  { %519 = shalt.err (!%p516_p12)
}
  0x3c   :  { %s520_s18 = scalar_lea.vmem %s633_s23, 512  ;;  %p525_p0 = scmp.lt.s32.totalorder %s633_s23, %s633_s23 }
  0x3d   :  { %p521_p13 = scmp.ne.s32.totalorder %s633_s23, %s520_s18  ;;  %p526_p1 = scmp.lt.s32.totalorder %s520_s18, %s520_s18 }
  0x3f   :  { %p527_p2 = por %p526_p1, %p525_p0 }
  0x41   :  { %p528_p3 = pnand %p527_p2, %p521_p13 }
  0x43   :  { %531 = shalt.err (!%p528_p3)
}
  0x44   :  { %61 = dma.hbm_to_vmem [thread:$0]  %s702_s3, 512, %s633_s23, [#allocation9], %s563_s28, %s563_s28, %s564_s29  }
  0x45   :  { %554 = dma.done.wait [#allocation3], 256  }
  0x46   :  { %555 = vsyncadd [#allocation3], 4294967040 }
  0x47   :  { %556 = dma.done.wait [#allocation6], 768  }
  0x48   :  { %557 = vsyncadd [#allocation6], 4294966528 }
  0x49   :  { %558 = dma.done.wait [#allocation9], 512  }
  0x4a   :  { %559 = vsyncadd [#allocation9], 4294966784  ;;  %v570_v0 = vmov 0.0   ;;  %vm571_vm0 = vmmov 0   ;;  %v426_v1 = vld [vmem:[#allocation5] sm:$0xff]   ;;  %v427_v2 = vld [vmem:[#allocation5 + $0x8] sm:$0xff]  }
  0x4b   :  { %383 = vmatprep.subr.bf16.mxu0 %v570_v0  ;;  %387 = vmatprep.mubr.msk.bf16.mxu0 %vm571_vm0, %v570_v0  ;;  %v77_v3 = vld [vmem:[#allocation2] sm:$0xff]  ;;  %v78_v4 = vld [vmem:[#allocation2 + $0x8] sm:$0xff]  ;;  %vm103_vm1 = vcmask 261120   ;;  %v430_v8 = vld [vmem:[#allocation7 + $0x10] sm:$0xff]   ;;  %vm187_vm2 = vcmask 523264  }
  0x4c   :  { %391 = vmatprep.subr.bf16.mxu1 %v570_v0  ;;  %399 = vmatprep.mubr.msk.bf16.mxu1 %vm571_vm0, %v570_v0  ;;  %v428_v5 = vld [vmem:[#allocation7] sm:$0xff]   ;;  %v429_v6 = vld [vmem:[#allocation7 + $0x8] sm:$0xff]   ;;  %v79_v7 = vpack.c.bf16 %v78_v4, %v77_v3  ;;  %v431_v9 = vld [vmem:[#allocation7 + $0x18] sm:$0xff]  }
  0x4d   :  { %384 = vmatpush3.bf16.msra.mxu0 %v426_v1  ;;  %392 = vmatpush3.bf16.msra.mxu1 %v428_v5  ;;  %v432_v10 = vld [vmem:[#allocation8] sm:$0xff]   ;;  %v433_v11 = vld [vmem:[#allocation8 + $0x8] sm:$0xff]   ;;  %v434_v22 = vld [vmem:[#allocation8 + $0x10] sm:$0xff]  }
  0x4e   :  { %385 = vmatprep.subr.bf16.mxu0 %v570_v0  ;;  %393 = vmatprep.subr.bf16.mxu1 %v570_v0  ;;  %v354_v12 = vld [vmem:[%s703_s4] ss:$0 sm:$0xff]  ;;  %v435_v23 = vld [vmem:[#allocation8 + $0x18] sm:$0xff]   ;;  %v358_v24 = vld [vmem:[%s703_s4 + $0x1] ss:$0 sm:$0xff] }
  0x4f   :  { %v364_v34 = vld [vmem:[%s703_s4 + $0x2] ss:$0 sm:$0xff]  ;;  %s572_s4 = smov [#allocation10]  }
  0x50   :  { %s340_s23 = sshll.u32 %s572_s4, 4  ;;  %s341_s23 = int_to_ptr.vmem [resolvable:$true] %s340_s23 }
  0x51   :  { %386 = vmatpush3.bf16.msra.mxu0 %v427_v2  ;;  %394 = vmatpush3.bf16.msra.mxu1 %v429_v6  ;;  %s532_s24 = scalar_lea.vmem %s341_s23, 256  ;;  %p537_p5 = scmp.lt.s32.totalorder %s341_s23, %s341_s23 }
  0x52   :  { %403 = vmatprep.subr.bf16.mxu0 %v570_v0  ;;  %395 = vmatprep.subr.bf16.mxu1 %v570_v0  ;;  %p533_p4 = scmp.ne.s32.totalorder %s341_s23, %s532_s24  ;;  %p538_p6 = scmp.lt.s32.totalorder %s532_s24, %s532_s24 }
  0x54   :  { %388 = vmatmul.mubr.msk.bf16.vlgmr.msra.gmra.mrb[0].mxu0 %vm103_vm1, %v79_v7  ;;  %p539_p7 = por %p538_p6, %p537_p5 }
  0x55   :  { %411 = vmatprep.mubr.msk.bf16.mxu0 %vm571_vm0, %v570_v0  ;;  %396 = vmatpush3.bf16.msra.mxu1 %v430_v8 }
  0x56   :  { %397 = vmatprep.subr.bf16.mxu1 %v570_v0  ;;  %404 = vmatpush3.bf16.msra.mxu0 %v432_v10  ;;  %p540_p8 = pnand %p539_p7, %p533_p4 }
  0x57   :  { %405 = vmatprep.subr.bf16.mxu0 %v570_v0 }
  0x59   :  { %398 = vmatpush3.bf16.msra.mxu1 %v431_v9 }
  0x5a   :  { %406 = vmatpush3.bf16.msra.mxu0 %v433_v11 }
  0x5b   :  { %407 = vmatprep.subr.bf16.mxu0 %v570_v0 }
  0x5e   :  { %408 = vmatpush3.bf16.msra.mxu0 %v434_v22 }
  0x5f   :  { %409 = vmatprep.subr.bf16.mxu0 %v570_v0 }
  0x62   :  { %410 = vmatpush3.bf16.msra.mxu0 %v435_v23 }
 0x127   :  { %v141_v13 = vpop.f32.mrb[0].mxu0 }
 0x128   :  { %v142_v14 = vadd.f32 %v354_v12, %v141_v13  ;;  %v389_v15 = vpop.f32.mrb[1].mxu0 }
 0x129   :  { %v144_v16 = vpop.f32.mrb[2].mxu0 }
 0x12a   :  { %v145_v17 = vadd.f32 %v354_v12, %v144_v16  ;;  %v390_v18 = vpop.f32.mrb[3].mxu0  ;;  %v148_v19 = vmax.f32 %v142_v14, 0.0 }
 0x12c   :  { %v149_v20 = vmax.f32 %v145_v17, 0.0 }
 0x12e   :  { %v150_v21 = vpack.c.bf16 %v149_v20, %v148_v19 }
 0x130   :  { %400 = vmatmul.mubr.msk.bf16.vlgmr.msra.gmra.mrb[0].mxu1 %vm187_vm2, %v150_v21 }
 0x203   :  { %v225_v25 = vpop.f32.mrb[0].mxu1 }
 0x204   :  { %v226_v26 = vadd.f32 %v358_v24, %v225_v25  ;;  %v401_v27 = vpop.f32.mrb[1].mxu1 }
 0x205   :  { %v228_v28 = vpop.f32.mrb[2].mxu1 }
 0x206   :  { %v229_v29 = vadd.f32 %v358_v24, %v228_v28  ;;  %v402_v30 = vpop.f32.mrb[3].mxu1  ;;  %v232_v31 = vmax.f32 %v226_v26, 0.0 }
 0x208   :  { %v233_v32 = vmax.f32 %v229_v29, 0.0 }
 0x20a   :  { %v234_v33 = vpack.c.bf16 %v233_v32, %v232_v31 }
 0x20c   :  { %412 = vmatmul.mubr.msk.bf16.vlgmr.msra.gmra.mrb[4].mxu0 %vm187_vm2, %v234_v33 }
 0x2df   :  { %v308_v35 = vpop.f32.mrb[4].mxu0 }
 0x2e0   :  { %v309_v36 = vadd.f32 %v364_v34, %v308_v35  ;;  %v413_v37 = vpop.f32.mrb[5].mxu0 }
 0x2e1   :  { %v311_v38 = vpop.f32.mrb[6].mxu0 }
 0x2e2   :  { %315 = vmax.xlane.f32.xlu0 %v309_v36  ;;  %v414_v39 = vpop.f32.mrb[7].mxu0  ;;  %v312_v40 = vadd.f32 %v364_v34, %v311_v38 }
 0x2e6   :  { %317 = vmax.xlane.f32.xlu0 %v312_v40 }
 0x36f   :  { %v316_v41 = vpop.xlane.xlu0 %315 }
 0x370   :  { %v319_v42 = vsub.f32 %v309_v36, %v316_v41 }
 0x372   :  { %v321_v43 = vmul.f32 1.442695, %v319_v42 }
 0x373   :  { %v318_v44 = vpop.xlane.xlu0 %317 }
 0x374   :  { %436 = vpow2.f32 %v321_v43  ;;  %v320_v45 = vsub.f32 %v312_v40, %v318_v44 }
 0x376   :  { %v323_v46 = vmul.f32 1.442695, %v320_v45 }
 0x378   :  { %438 = vpow2.f32 %v323_v46 }
 0x37e   :  { %v437_v47 = vpop.eup %436 }
 0x37f   :  { %325 = vadd.xlane.f32.xlu1 %v437_v47 }
 0x382   :  { %v439_v48 = vpop.eup %438 }
 0x383   :  { %327 = vadd.xlane.f32.xlu1 %v439_v48 }
 0x40c   :  { %v326_v49 = vpop.xlane.xlu1 %325 }
 0x40d   :  { %440 = vrcp.f32 %v326_v49 }
 0x410   :  { %v328_v50 = vpop.xlane.xlu1 %327 }
 0x411   :  { %442 = vrcp.f32 %v328_v50 }
 0x417   :  { %v441_v51 = vpop.eup %440 }
 0x418   :  { %v331_v52 = vmul.f32 %v441_v51, %v437_v47 }
 0x41a   :  { %333 = vst [vmem:[#allocation10] sm:$0xff] %v331_v52 }
 0x41b   :  { %v443_v53 = vpop.eup %442 }
 0x41c   :  { %v332_v54 = vmul.f32 %v443_v53, %v439_v48 }
 0x41e   :  { %334 = vst [vmem:[#allocation10 + $0x8] sm:$0xff] %v332_v54 }
 0x41f   :  { %543 = shalt.err (!%p540_p8)
}
 0x420   :  { %s544_s27 = scalar_lea.hbm %s704_s5, 256 }
 0x421   :  { %p545_p9 = scmp.ne.s32.totalorder %s704_s5, %s544_s27  ;;  %p548_p10 = scmp.lt.u32.totalorder %s544_s27, %s704_s5 }
 0x423   :  { %p550_p11 = pnand %p548_p10, %p545_p9 }
 0x425   :  { %553 = shalt.err (!%p550_p11)
}
 0x426   :  { %346 = dma.vmem_to_hbm [thread:$0]  %s341_s23, 256, %s704_s5, [#allocation4], %s566_s1, %s566_s1, %s567_s17  }
 0x427   :  { %560 = dma.done.wait [#allocation4], 256  }
 0x428   :  { %561 = vsyncadd [#allocation4], 4294967040 }
 0x429   :  { %350 = vsyncpa [#allocation3], 1 }
 0x42a   :  { %351 = vsyncpa [#allocation6], 1 }
 0x42b   :  { %352 = vsyncpa [#allocation9], 1 }
 0x42c   :  { %353 = vsyncpa [#allocation4], 1 }

</bundles_post_ra>
